<compile_context>
chip_gen: v7x
topology: tpu7x:2x2x1
jax: 0.10.0
libtpu: 0.0.40
codegen_flags: <defaults>
</compile_context>

<pallas_src>
import functools

import jax
import jax.numpy as jnp
from jax.experimental import pallas as pl
from jax.experimental.pallas import tpu as pltpu


# ---------------------------------------------------------------------------
# Hardware-aware sizing helpers
# ---------------------------------------------------------------------------
def _pick_vmem_limit():
    """Per-generation VMEM limit (bytes): ~3/4 of physical, capped at 100 MiB.
    v5e/v6e (128 MiB) -> ~96 MiB; v7x (64 MiB) -> 48 MiB; 48 MiB fallback."""
    try:
        cap = int(pltpu.get_tpu_info().vmem_capacity_bytes)
    except Exception:
        cap = 64 << 20
    return max(32 << 20, min((cap * 3) // 4, 100 << 20))


def _num_tensorcores():
    """Best-effort: 2 TensorCores per chip on v7x, 1 on v5e/v6e."""
    try:
        kind = jax.devices()[0].device_kind.lower()
    except Exception:
        return 1
    return 2 if "v7" in kind else 1


def _choose_b_tile(B, C, HW, itemsize, vmem_limit, num_tc):
    """Largest batch tile whose double-buffered in+out blocks (~4x block) fit
    comfortably; only cap for >=num_tc grid steps when there are 2 TCs."""
    per_image = max(C * HW * itemsize, 1)
    block_budget = max(per_image, vmem_limit // 6)   # ~4x block <= 2/3 limit
    bt = max(1, min(B, block_budget // per_image))
    if num_tc > 1 and B >= num_tc:
        bt = min(bt, max(1, B // num_tc))            # keep both v7x TCs busy
    while B % bt:                                    # exact grid
        bt -= 1
    return bt


def _choose_hw_tile(C, HW, itemsize, vmem_limit):
    """HW tile (multiple of 128) for the two-pass fallback, a few MiB/block."""
    block_budget = max(128 * C * itemsize, vmem_limit // 6)
    t = block_budget // max(C * itemsize, 1)
    t = max(128, (t // 128) * 128)
    hw_ceil = ((HW + 127) // 128) * 128
    return min(t, hw_ceil)


# ---------------------------------------------------------------------------
# Single-pass kernel: pool + gate + scale on whole images
# ---------------------------------------------------------------------------
def _se_kernel(x_ref, w1t_ref, b1_ref, w2t_ref, b2_ref, o_ref, *, inv_hw):
    x = x_ref[...]                                          # (bt, C, HW)
    # Squeeze: global average pool (accumulate in f32, divide by true HW).
    pooled = jnp.sum(x.astype(jnp.float32), axis=2) * inv_hw        # (bt, C)
    # Reduce 1x1 conv + ReLU  (tiny GEMM; not the bottleneck).
    hid = jnp.dot(pooled, w1t_ref[...], preferred_element_type=jnp.float32)
    hid = jnp.maximum(hid + b1_ref[...], 0.0)                       # (bt, Crd)
    # Expand 1x1 conv + sigmoid.
    g = jnp.dot(hid, w2t_ref[...], preferred_element_type=jnp.float32)
    g = jax.nn.sigmoid(g + b2_ref[...])                             # (bt, C)
    # Excite: per-channel scale in the storage dtype (no f32 block temp).
    o_ref[...] = x * g.astype(o_ref.dtype)[:, :, None]


# ---------------------------------------------------------------------------
# Two-pass fallback (images too large to double-buffer whole)
# ---------------------------------------------------------------------------
def _pool_gate_kernel(x_ref, w1t_ref, b1_ref, w2t_ref, b2_ref, g_ref, acc_ref,
                      *, inv_hw, hw_tile, hw_total):
    h = pl.program_id(1)

    @pl.when(h == 0)
    def _():
        acc_ref[...] = jnp.zeros_like(acc_ref)

    x = x_ref[...]                                          # (1, C, hw_tile)
    lane = jax.lax.broadcasted_iota(jnp.int32, x.shape, 2)
    valid = hw_total - h * hw_tile                          # mask tail block
    xf = jnp.where(lane < valid, x.astype(jnp.float32), 0.0)
    acc_ref[...] += jnp.sum(xf, axis=2)                     # (1, C)

    @pl.when(h == pl.num_programs(1) - 1)
    def _():
        pooled = acc_ref[...] * inv_hw                      # (1, C)
        hid = jnp.dot(pooled, w1t_ref[...], preferred_element_type=jnp.float32)
        hid = jnp.maximum(hid + b1_ref[...], 0.0)
        g = jnp.dot(hid, w2t_ref[...], preferred_element_type=jnp.float32)
        g = jax.nn.sigmoid(g + b2_ref[...])                 # (1, C)
        g_ref[...] = g[:, None, :]                          # (1, 1, C)


def _scale_kernel(x_ref, g_ref, o_ref):
    g = g_ref[...][:, 0, :]                                 # (1, C) f32
    o_ref[...] = x_ref[...] * g.astype(o_ref.dtype)[:, :, None]


def _se_two_pass(x, w1t, b1r, w2t, b2r, *, B, C, C_rd, HW, dt, vmem_limit):
    itemsize = jnp.dtype(dt).itemsize
    hw_tile = _choose_hw_tile(C, HW, itemsize, vmem_limit)
    n_hw = pl.cdiv(HW, hw_tile)

    gate = pl.pallas_call(
        functools.partial(_pool_gate_kernel, inv_hw=float(1.0 / HW),
                          hw_tile=hw_tile, hw_total=HW),
        out_shape=jax.ShapeDtypeStruct((B, 1, C), jnp.float32),
        grid_spec=pltpu.PrefetchScalarGridSpec(
            num_scalar_prefetch=0,
            grid=(B, n_hw),
            in_specs=[
                pl.BlockSpec((1, C, hw_tile), lambda b, h: (b, 0, h)),
                pl.BlockSpec((C, C_rd), lambda b, h: (0, 0)),
                pl.BlockSpec((1, C_rd), lambda b, h: (0, 0)),
                pl.BlockSpec((C_rd, C), lambda b, h: (0, 0)),
                pl.BlockSpec((1, C), lambda b, h: (0, 0)),
            ],
            out_specs=pl.BlockSpec((1, 1, C), lambda b, h: (b, 0, 0)),
            scratch_shapes=[pltpu.VMEM((1, C), jnp.float32)],
        ),
        compiler_params=pltpu.CompilerParams(
            dimension_semantics=("parallel", "arbitrary"),
            vmem_limit_bytes=vmem_limit),
    )(x, w1t, b1r, w2t, b2r)

    out = pl.pallas_call(
        _scale_kernel,
        out_shape=jax.ShapeDtypeStruct((B, C, HW), dt),
        grid_spec=pltpu.PrefetchScalarGridSpec(
            num_scalar_prefetch=0,
            grid=(B, n_hw),
            in_specs=[
                pl.BlockSpec((1, C, hw_tile), lambda b, h: (b, 0, h)),
                pl.BlockSpec((1, 1, C), lambda b, h: (b, 0, 0)),
            ],
            out_specs=pl.BlockSpec((1, C, hw_tile), lambda b, h: (b, 0, h)),
        ),
        compiler_params=pltpu.CompilerParams(
            dimension_semantics=("parallel", "parallel"),
            vmem_limit_bytes=vmem_limit),
    )(x, gate)
    return out


# ---------------------------------------------------------------------------
# Public wrapper
# ---------------------------------------------------------------------------
def se_block(x_nchw, w1, b1, w2, b2):
    """SEBlock forward.
    x_nchw: (B, C, H, W); w1: (C_rd, C); b1: (C_rd,); w2: (C, C_rd); b2: (C,).
    Output dtype matches the input (gate math is done in f32)."""
    B, C, H, W = x_nchw.shape
    C_rd = w1.shape[0]
    HW = H * W
    dt = x_nchw.dtype
    itemsize = jnp.dtype(dt).itemsize

    # Free metadata reshape; NO padding / slicing round-trips through HBM.
    x = x_nchw.reshape(B, C, HW)

    # Tiny gate parameters: f32, transposed for (batch, chan) GEMMs.
    w1t = jnp.asarray(w1, jnp.float32).T           # (C, C_rd)
    w2t = jnp.asarray(w2, jnp.float32).T           # (C_rd, C)
    b1r = jnp.asarray(b1, jnp.float32).reshape(1, C_rd)
    b2r = jnp.asarray(b2, jnp.float32).reshape(1, C)

    vmem_limit = _pick_vmem_limit()
    num_tc = _num_tensorcores()
    per_image = C * HW * itemsize
    bt = _choose_b_tile(B, C, HW, itemsize, vmem_limit, num_tc)

    # VMEM-fit guard: 2x in + 2x out blocks (+ headroom) must fit the limit.
    if 4 * bt * per_image + (2 << 20) <= vmem_limit:
        out = pl.pallas_call(
            functools.partial(_se_kernel, inv_hw=float(1.0 / HW)),
            out_shape=jax.ShapeDtypeStruct((B, C, HW), dt),
            grid_spec=pltpu.PrefetchScalarGridSpec(
                num_scalar_prefetch=0,
                grid=(B // bt,),
                in_specs=[
                    pl.BlockSpec((bt, C, HW), lambda b: (b, 0, 0)),
                    pl.BlockSpec((C, C_rd), lambda b: (0, 0)),
                    pl.BlockSpec((1, C_rd), lambda b: (0, 0)),
                    pl.BlockSpec((C_rd, C), lambda b: (0, 0)),
                    pl.BlockSpec((1, C), lambda b: (0, 0)),
                ],
                out_specs=pl.BlockSpec((bt, C, HW), lambda b: (b, 0, 0)),
            ),
            compiler_params=pltpu.CompilerParams(
                dimension_semantics=("parallel",),
                vmem_limit_bytes=vmem_limit),
        )(x, w1t, b1r, w2t, b2r)
    else:
        # Huge single images (e.g. C=64, 224x224 f32): two HBM passes but
        # pipelined HW-tiled blocks instead of VMEM OOM.
        out = _se_two_pass(x, w1t, b1r, w2t, b2r, B=B, C=C, C_rd=C_rd, HW=HW,
                           dt=dt, vmem_limit=vmem_limit)

    return out.reshape(B, C, H, W)


def se_block_ref(x, w1, b1, w2, b2):
    xf = x.astype(jnp.float32)
    pooled = jnp.mean(xf, axis=(2, 3))                          # (B, C)
    h = jnp.maximum(pooled @ w1.T.astype(jnp.float32) + b1, 0.0)
    g = jax.nn.sigmoid(h @ w2.T.astype(jnp.float32) + b2)
    return (xf * g[:, :, None, None]).astype(x.dtype)


if __name__ == "__main__":
    B, C, H, W = 2, 16, 14, 14          # classic SE spatial; HW=196 (no pad)
    rd_ratio = 0.0625
    C_rd = max(1, int(C * rd_ratio))    # 1

    key = jax.random.PRNGKey(0)
    k_x, k_w1, k_b1, k_w2, k_b2 = jax.random.split(key, 5)
    x = jax.random.normal(k_x, (B, C, H, W), dtype=jnp.float32)
    # 1x1 conv weights squeezed to 2-D (out_ch, in_ch) + biases
    w1 = 0.1 * jax.random.normal(k_w1, (C_rd, C), dtype=jnp.float32)
    b1 = 0.1 * jax.random.normal(k_b1, (C_rd,), dtype=jnp.float32)
    w2 = 0.1 * jax.random.normal(k_w2, (C, C_rd), dtype=jnp.float32)
    b2 = 0.1 * jax.random.normal(k_b2, (C,), dtype=jnp.float32)

    out = jax.block_until_ready(se_block(x, w1, b1, w2, b2))
    ref = jax.block_until_ready(se_block_ref(x, w1, b1, w2, b2))
    assert out.shape == (B, C, H, W)
    assert out.dtype == x.dtype
    assert jnp.allclose(out, ref, atol=1e-5, rtol=1e-5)
    print("KERNEL_OK")
</pallas_src>

<mosaic_0001>
module attributes {stable_mosaic.version = 11 : i64} {
  func.func @_se_kernel(%arg0: i32, %arg1: memref<2x16x196xf32, #tpu.memory_space<vmem>>, %arg2: memref<16x1xf32, #tpu.memory_space<vmem>>, %arg3: memref<1x1xf32, #tpu.memory_space<vmem>>, %arg4: memref<1x16xf32, #tpu.memory_space<vmem>>, %arg5: memref<1x16xf32, #tpu.memory_space<vmem>>, %arg6: memref<2x16x196xf32, #tpu.memory_space<vmem>>) attributes {dimension_semantics = [#tpu.dimension_semantics<parallel>], iteration_bounds = array<i64: 1>, scalar_prefetch = 0 : i64, scratch_operands = 0 : i64, tpu.core_type = #tpu.core_type<tc>, window_params = [{transform_indices = @transform_0, window_bounds = array<i64: 2, 16, 196>}, {pipeline_mode = #tpu.pipeline_mode<synchronous>, transform_indices = @transform_1, window_bounds = array<i64: 16, 1>}, {pipeline_mode = #tpu.pipeline_mode<synchronous>, transform_indices = @transform_2, window_bounds = array<i64: 1, 1>}, {pipeline_mode = #tpu.pipeline_mode<synchronous>, transform_indices = @transform_3, window_bounds = array<i64: 1, 16>}, {pipeline_mode = #tpu.pipeline_mode<synchronous>, transform_indices = @transform_4, window_bounds = array<i64: 1, 16>}, {transform_indices = @transform_5, window_bounds = array<i64: 2, 16, 196>}]} {
    %c0 = arith.constant 0 : index
    %c0_0 = arith.constant 0 : index
    %c0_1 = arith.constant 0 : index
    %0 = vector.load %arg1[%c0, %c0_0, %c0_1] : memref<2x16x196xf32, #tpu.memory_space<vmem>>, vector<2x16x196xf32>
    %cst = arith.constant dense<0.000000e+00> : vector<2x16xf32>
    %1 = vector.multi_reduction <add>, %0, %cst [2] : vector<2x16x196xf32> to vector<2x16xf32>
    %cst_2 = arith.constant 0.00510204071 : f32
    %2 = vector.broadcast %cst_2 : f32 to vector<2x16xf32>
    %3 = arith.mulf %1, %2 : vector<2x16xf32>
    %c0_3 = arith.constant 0 : index
    %c0_4 = arith.constant 0 : index
    %4 = vector.load %arg2[%c0_3, %c0_4] : memref<16x1xf32, #tpu.memory_space<vmem>>, vector<16x1xf32>
    %cst_5 = arith.constant dense<0.000000e+00> : vector<2x1xf32>
    %5 = tpu.matmul %3, %4, %cst_5 {dimension_numbers = #tpu.dot_dimension_numbers<[1], [0], [0], [1], [0, 0, 1, 1], [], []>} : vector<2x16xf32>, vector<16x1xf32>, vector<2x1xf32> -> vector<2x1xf32>
    %c0_6 = arith.constant 0 : index
    %c0_7 = arith.constant 0 : index
    %6 = vector.load %arg3[%c0_6, %c0_7] : memref<1x1xf32, #tpu.memory_space<vmem>>, vector<1x1xf32>
    %7 = vector.broadcast %6 : vector<1x1xf32> to vector<2x1xf32>
    %8 = arith.addf %5, %7 : vector<2x1xf32>
    %cst_8 = arith.constant 0.000000e+00 : f32
    %9 = vector.broadcast %cst_8 : f32 to vector<2x1xf32>
    %10 = arith.maximumf %8, %9 : vector<2x1xf32>
    %c0_9 = arith.constant 0 : index
    %c0_10 = arith.constant 0 : index
    %11 = vector.load %arg4[%c0_9, %c0_10] : memref<1x16xf32, #tpu.memory_space<vmem>>, vector<1x16xf32>
    %cst_11 = arith.constant dense<0.000000e+00> : vector<2x16xf32>
    %12 = tpu.matmul %10, %11, %cst_11 {dimension_numbers = #tpu.dot_dimension_numbers<[1], [0], [0], [1], [0, 0, 1, 1], [], []>} : vector<2x1xf32>, vector<1x16xf32>, vector<2x16xf32> -> vector<2x16xf32>
    %c0_12 = arith.constant 0 : index
    %c0_13 = arith.constant 0 : index
    %13 = vector.load %arg5[%c0_12, %c0_13] : memref<1x16xf32, #tpu.memory_space<vmem>>, vector<1x16xf32>
    %14 = vector.broadcast %13 : vector<1x16xf32> to vector<2x16xf32>
    %15 = arith.addf %12, %14 : vector<2x16xf32>
    %16 = arith.negf %15 : vector<2x16xf32>
    %17 = math.exp %16 : vector<2x16xf32>
    %cst_14 = arith.constant 1.000000e+00 : f32
    %18 = vector.broadcast %cst_14 : f32 to vector<2x16xf32>
    %19 = arith.addf %18, %17 : vector<2x16xf32>
    %20 = arith.divf %18, %19 : vector<2x16xf32>
    %21 = vector.shape_cast %20 : vector<2x16xf32> to vector<2x16x1xf32>
    %22 = vector.broadcast %21 : vector<2x16x1xf32> to vector<2x16x196xf32>
    %23 = arith.mulf %0, %22 : vector<2x16x196xf32>
    %c0_15 = arith.constant 0 : index
    %c0_16 = arith.constant 0 : index
    %c0_17 = arith.constant 0 : index
    %24 = vector.load %arg6[%c0_15, %c0_16, %c0_17] : memref<2x16x196xf32, #tpu.memory_space<vmem>>, vector<2x16x196xf32>
    tpu.vector_store %arg6[%c0_15, %c0_16, %c0_17], %23 {strides = array<i32>} : memref<2x16x196xf32, #tpu.memory_space<vmem>>, vector<2x16x196xf32>,
    return
  }
  func.func @transform_0(%arg0: i32) -> (i32, i32, i32) {
    %c0_i32 = arith.constant 0 : i32
    %c0_i32_0 = arith.constant 0 : i32
    %c0_i32_1 = arith.constant 0 : i32
    return %arg0, %c0_i32, %c0_i32_0 : i32, i32, i32
  }
  func.func @transform_1(%arg0: i32) -> (i32, i32) {
    %c0_i32 = arith.constant 0 : i32
    %c0_i32_0 = arith.constant 0 : i32
    %c0_i32_1 = arith.constant 0 : i32
    return %c0_i32, %c0_i32_0 : i32, i32
  }
  func.func @transform_2(%arg0: i32) -> (i32, i32) {
    %c0_i32 = arith.constant 0 : i32
    %c0_i32_0 = arith.constant 0 : i32
    %c0_i32_1 = arith.constant 0 : i32
    return %c0_i32, %c0_i32_0 : i32, i32
  }
  func.func @transform_3(%arg0: i32) -> (i32, i32) {
    %c0_i32 = arith.constant 0 : i32
    %c0_i32_0 = arith.constant 0 : i32
    %c0_i32_1 = arith.constant 0 : i32
    return %c0_i32, %c0_i32_0 : i32, i32
  }
  func.func @transform_4(%arg0: i32) -> (i32, i32) {
    %c0_i32 = arith.constant 0 : i32
    %c0_i32_0 = arith.constant 0 : i32
    %c0_i32_1 = arith.constant 0 : i32
    return %c0_i32, %c0_i32_0 : i32, i32
  }
  func.func @transform_5(%arg0: i32) -> (i32, i32, i32) {
    %c0_i32 = arith.constant 0 : i32
    %c0_i32_0 = arith.constant 0 : i32
    %c0_i32_1 = arith.constant 0 : i32
    return %arg0, %c0_i32, %c0_i32_0 : i32, i32, i32
  }
}

</mosaic_0001>

<bundles_post_ra>
// kernel: tpu_custom_call.1
= control target key start
LH: loop header
LB: loop body
LE: loop exit
PB: predicated region body
PF: predicated region fallthrough
CT: control target
= control target key end

     0   :  { %s531_s0 = inlined_call_operand.hbm [shape: f32[2,16,196], index: 0, kind: input, shape index: {}]   ;;  %s532_s1 = inlined_call_operand.vmem [shape: f32[16,1], index: 1, kind: input, shape index: {}]   ;;  %s533_s2 = inlined_call_operand.<no memory space> [shape: f32[1,1], index: 2, kind: input, shape index: {}]   ;;  %s534_s3 = inlined_call_operand.vmem [shape: f32[1,16], index: 3, kind: input, shape index: {}]   ;;  %s535_s4 = inlined_call_operand.vmem [shape: f32[1,16], index: 4, kind: input, shape index: {}]   ;;  %s536_s5 = inlined_call_operand.hbm [shape: f32[2,16,196], index: 5, kind: output, shape index: {}]  }
   0x1   :  { %v10_v0 = vstv %s533_s2 }
   0x2   :  { %11 = vst [vmem:[#allocation2] sm:$0x1] %v10_v0 }
   0x3   :  { %12 = vsyncpa [#allocation4], 0 }
   0x4   :  { %13 = vsyncpa [#allocation5], 0  ;;  %s409_s20 = smov [#allocation3]   ;;  %s361_s24 = scalar_lea.hbm %s531_s0, 1024 }
   0x5   :  { %s19_s21 = sshll.u32 %s409_s20, 4  ;;  %p362_p0 = scmp.ne.s32.totalorder %s531_s0, %s361_s24  ;;  %s20_s21 = int_to_ptr.vmem [resolvable:$true] %s19_s21 }
   0x6   :  { %p365_p1 = scmp.lt.u32.totalorder %s361_s24, %s531_s0 }
   0x8   :  { %p367_p2 = pnand %p365_p1, %p362_p0 }
   0xa   :  { %370 = shalt.err (!%p367_p2)
}
   0xb   :  { %s371_s2 = scalar_lea.vmem %s20_s21, 1024  ;;  %p376_p4 = scmp.lt.s32.totalorder %s20_s21, %s20_s21 }
   0xc   :  { %p372_p3 = scmp.ne.s32.totalorder %s20_s21, %s371_s2  ;;  %p377_p5 = scmp.lt.s32.totalorder %s371_s2, %s371_s2 }
   0xe   :  { %p378_p6 = por %p377_p5, %p376_p4 }
  0x10   :  { %p379_p7 = pnand %p378_p6, %p372_p3 }
  0x12   :  { %382 = shalt.err (!%p379_p7)
}
  0x13   :  { %s410_s29 = smov 256   ;;  %s411_s30 = smov 16  }
  0x14   :  { %25 = dma.hbm_to_vmem [thread:$0]  %s531_s0, 1024, %s20_s21, [#allocation4], %s410_s29, %s410_s29, %s411_s30  }
  0x15   :  { %405 = dma.done.wait [#allocation4], 1024  }
  0x16   :  { %406 = vsyncadd [#allocation4], 4294966272  ;;  %vm45_vm0 = vcmask 556032   ;;  %v464_v1 = vld [vmem:[#allocation3 + $0x20] sm:$0xff]  ;;  %v466_v2 = vld [vmem:[#allocation3 + $0x28] sm:$0xff]  ;;  %v412_v20 = vmov 0.0|0.0   ;;  %v79_v22 = vlaneseq }
  0x17   :  { %v468_v3 = vld [vmem:[#allocation3] sm:$0xff]  ;;  %v54_v4 = vsel %vm45_vm0, %v466_v2, 0.0  ;;  %v472_v5 = vld [vmem:[#allocation3 + $0x8] sm:$0xff]  ;;  %v474_v6 = vld [vmem:[#allocation3 + $0x30] sm:$0xff]  ;;  %347 = vmatprep.subr.bf16.mxu0 %v412_v20  ;;  %vm413_vm1 = vmmov 0   ;;  %v414_v21 = vmov 0.0  }
  0x18   :  { %v476_v7 = vld [vmem:[#allocation3 + $0x38] sm:$0xff]  ;;  %v55_v8 = vadd.f32 %v54_v4, %v464_v1  ;;  %v46_v9 = vsel %vm45_vm0, %v472_v5, 0.0  ;;  %v483_v11 = vld [vmem:[#allocation3 + $0x10] sm:$0xff]  ;;  %v67_v18 = vld [vmem:[%s532_s1 + $0x8] sm:$0xff]  ;;  %339 = vmatprep.mubr.msk.f32.mxu0 %vm413_vm1, %v414_v21  ;;  %342 = vmatprep.subr.mxu1 %v414_v21  ;;  %v80_v23 = vand.u32 127, %v79_v22  ;;  %v82_v24 = vshrl.u32 %v79_v22, 7 }
  0x19   :  { %v58_v10 = vsel %vm45_vm0, %v476_v7, 0.0  ;;  %v485_v12 = vld [vmem:[#allocation3 + $0x18] sm:$0xff]  ;;  %v47_v13 = vadd.f32 %v46_v9, %v468_v3  ;;  %344 = vmatprep.mubr.msk.f32.mxu1 %vm413_vm1, %v414_v21  ;;  %vm90_vm2 = vcmask 130112   ;;  %vm101_vm3 = vcmask 1041409  }
  0x1a   :  { %v50_v14 = vsel %vm45_vm0, %v485_v12, 0.0  ;;  %56 = vadd.xlane.f32.xlu1 %v55_v8  ;;  %v59_v15 = vadd.f32 %v58_v10, %v474_v6  ;;  %v66_v17 = vld [vmem:[%s532_s1] sm:$0xff]  ;;  %v85_v25 = vadd.s32 4294967288, %v80_v23  ;;  %v83_v28 = vsub.s32 %v80_v23, %v82_v24 }
  0x1b   :  { %48 = vadd.xlane.f32.xlu0 %v47_v13  ;;  %v51_v16 = vadd.f32 %v50_v14, %v483_v11  ;;  %v348_v19 = vpack.c.bf16 %v67_v18, %v66_v17  ;;  %vm103_vm4 = vcmask 130048   ;;  %v177_v43 = vld [vmem:[%s534_s3] sm:$0x1]  ;;  %vm189_vm5 = vcmask 1040384   ;;  %s415_s3 = smov [#allocation6]  }
  0x1c   :  { %v88_v30 = vsub.s32 %v85_v25, %v82_v24  ;;  %343 = vmatpush3.msk.msra.mxu1 %vm189_vm5, %v177_v43  ;;  %v324_v44 = vld [vmem:[#allocation2] ss:$0 sm:$0xff]  ;;  %vm185_vm6 = vcmask 7168   ;;  %v271_v56 = vsub.s32 0, %v82_v24  ;;  %v282_v59 = vsub.s32 1, %v82_v24 }
  0x1d   :  { %349 = vmatpush3.bf16.msra.mxu0 %v348_v19  ;;  %v326_v49 = vld [vmem:[%s535_s4] ss:$0 sm:$0xff]  ;;  %s312_s4 = sshll.u32 %s415_s3, 4  ;;  %s313_s4 = int_to_ptr.vmem [resolvable:$true] %s312_s4 }
  0x1e   :  { %60 = vadd.xlane.f32.xlu1 %v59_v15  ;;  %s383_s14 = scalar_lea.vmem %s313_s4, 1024  ;;  %p388_p9 = scmp.lt.s32.totalorder %s313_s4, %s313_s4 }
  0x1f   :  { %52 = vadd.xlane.f32.xlu0 %v51_v16  ;;  %p384_p8 = scmp.ne.s32.totalorder %s313_s4, %s383_s14  ;;  %p389_p10 = scmp.lt.s32.totalorder %s383_s14, %s383_s14 }
  0x21   :  { %p390_p11 = por %p389_p10, %p388_p9 }
  0x23   :  { %p391_p12 = pnand %p390_p11, %p384_p8 }
  0xa7   :  { %v57_v26 = vpop.xlane.xlu1 %56 }
  0xa8   :  { %v49_v27 = vpop.xlane.xlu0 %48  ;;  %v64_v29 = vmul.f32 0.0051020407, %v57_v26 }
  0xa9   :  { %v62_v31 = vmul.f32 0.0051020407, %v49_v27 }
  0xaa   :  { %v95_v36 = vrot.slane %v64_v29, %v83_v28 }
  0xab   :  { %v61_v32 = vpop.xlane.xlu1 %60  ;;  %v84_v38 = vrot.slane %v62_v31, %v83_v28 }
  0xac   :  { %v65_v33 = vmul.f32 0.0051020407, %v61_v32  ;;  %v53_v34 = vpop.xlane.xlu0 %52 }
  0xad   :  { %v63_v35 = vmul.f32 0.0051020407, %v53_v34 }
  0xae   :  { %v99_v37 = vrot.slane %v65_v33, %v88_v30 }
  0xaf   :  { %v89_v39 = vrot.slane %v63_v35, %v88_v30 }
  0xb0   :  { %v100_v40 = vsel %vm90_vm2, %v99_v37, %v95_v36 }
  0xb1   :  { %v91_v41 = vsel %vm90_vm2, %v89_v39, %v84_v38 }
  0xb2   :  { %v102_v42 = vsel %vm101_vm3, %v100_v40, %v91_v41 }
  0xb3   :  { %340 = vmatmul.mubr.msk.f32.vlgmr.msra.gmra.mrb[0].mxu0 %vm103_vm4, %v102_v42 }
 0x186   :  { %v172_v45 = vpop.f32.mrb[0].mxu0 }
 0x187   :  { %v173_v46 = vadd.f32 %v324_v44, %v172_v45  ;;  %v341_v47 = vpop.f32.mrb[1].mxu0 }
 0x189   :  { %v176_v48 = vmax.f32 %v173_v46, 0.0 }
 0x18b   :  { %345 = vmatmul.mubr.msk.f32.vlgmr.msra.gmra.mrb[0].mxu1 %vm185_vm6, %v176_v48 }
 0x25e   :  { %v259_v50 = vpop.f32.mrb[0].mxu1 }
 0x25f   :  { %v260_v51 = vadd.f32 %v326_v49, %v259_v50  ;;  %v346_v52 = vpop.f32.mrb[1].mxu1 }
 0x261   :  { %v329_v53 = vmul.f32 -1.442695, %v260_v51 }
 0x263   :  { %357 = vpow2.f32 %v329_v53 }
 0x26d   :  { %v358_v54 = vpop.eup %357 }
 0x26e   :  { %v266_v55 = vadd.f32 1.0, %v358_v54 }
 0x270   :  { %359 = vrcp.f32 %v266_v55 }
 0x27a   :  { %v360_v57 = vpop.eup %359 }
 0x27b   :  { %v272_v58 = vrot.slane %v360_v57, %v271_v56  ;;  %v283_v60 = vrot.slane %v360_v57, %v282_v59 }
 0x27d   :  { %278 = vbcast.lane.b32.xlu1 %v272_v58, 264  ;;  %274 = vbcast.lane.b32.xlu0 %v272_v58, 256 }
 0x281   :  { %285 = vbcast.lane.b32.xlu1 %v283_v60, 256 }
 0x285   :  { %289 = vbcast.lane.b32.xlu1 %v283_v60, 264 }
 0x2ef   :  { %v279_v61 = vpop.permute.xlu1 %278  ;;  %v275_v62 = vpop.permute.xlu0 %274 }
 0x2f0   :  { %v293_v63 = vmul.f32 %v279_v61, %v483_v11  ;;  %v294_v0 = vmul.f32 %v279_v61, %v485_v12  ;;  %v291_v4 = vmul.f32 %v275_v62, %v468_v3  ;;  %v292_v8 = vmul.f32 %v275_v62, %v472_v5 }
 0x2f2   :  { %301 = vst [vmem:[#allocation6 + $0x10] sm:$0xff] %v293_v63  ;;  %302 = vst.msk [vmem:[#allocation6 + $0x18] sm:$0xff] %vm45_vm0, %v294_v0 }
 0x2f3   :  { %299 = vst [vmem:[#allocation6] sm:$0xff] %v291_v4  ;;  %300 = vst.msk [vmem:[#allocation6 + $0x8] sm:$0xff] %vm45_vm0, %v292_v8  ;;  %v286_v9 = vpop.permute.xlu1 %285 }
 0x2f4   :  { %v295_v10 = vmul.f32 %v286_v9, %v464_v1  ;;  %v296_v13 = vmul.f32 %v286_v9, %v466_v2 }
 0x2f6   :  { %303 = vst [vmem:[#allocation6 + $0x20] sm:$0xff] %v295_v10  ;;  %304 = vst.msk [vmem:[#allocation6 + $0x28] sm:$0xff] %vm45_vm0, %v296_v13 }
 0x2f7   :  { %v290_v11 = vpop.permute.xlu1 %289 }
 0x2f8   :  { %v297_v3 = vmul.f32 %v290_v11, %v474_v6  ;;  %v298_v5 = vmul.f32 %v290_v11, %v476_v7 }
 0x2fa   :  { %305 = vst [vmem:[#allocation6 + $0x30] sm:$0xff] %v297_v3  ;;  %306 = vst.msk [vmem:[#allocation6 + $0x38] sm:$0xff] %vm45_vm0, %v298_v5 }
 0x2fb   :  { %394 = shalt.err (!%p391_p12)
}
 0x2fc   :  { %s395_s17 = scalar_lea.hbm %s536_s5, 1024 }
 0x2fd   :  { %p396_p13 = scmp.ne.s32.totalorder %s536_s5, %s395_s17  ;;  %p399_p0 = scmp.lt.u32.totalorder %s395_s17, %s536_s5 }
 0x2ff   :  { %p401_p1 = pnand %p399_p0, %p396_p13 }
 0x301   :  { %404 = shalt.err (!%p401_p1)
}
 0x302   :  { %318 = dma.vmem_to_hbm [thread:$0]  %s313_s4, 1024, %s536_s5, [#allocation5], %s410_s29, %s410_s29, %s411_s30  }
 0x303   :  { %407 = dma.done.wait [#allocation5], 1024  }
 0x304   :  { %408 = vsyncadd [#allocation5], 4294966272 }
 0x305   :  { %322 = vsyncpa [#allocation4], 1 }
 0x306   :  { %323 = vsyncpa [#allocation5], 1 }

</bundles_post_ra>
